<compile_context>
chip_gen: v7x
topology: tpu7x:2x2x1
jax: 0.10.0
libtpu: 0.0.40
codegen_flags: <defaults>
</compile_context>

<pallas_src>
import functools

import jax
import jax.numpy as jnp
from jax.experimental import pallas as pl
from jax.experimental.pallas import tpu as pltpu


def _round_up(x, m):
    return ((x + m - 1) // m) * m


def gatenn_kernel(hidden_ref, in1_ref, in2_ref,
                  w1h_ref, w1i_ref, b1_ref,
                  w2h_ref, w2i_ref, b2_ref,
                  out_ref, *, hp, operand_dtype):
    """Fused two-layer GateNN over one [tb, *] row block.

    Packed layout (pack_gatenn_params): per layer one [K, 2*hp] weight per input
    part, columns = [tanh-path | 0.5*gate-path], each half hp (multiple of 128)
    lanes wide, so the split below never crosses a vreg and stores are lane-dense.
    """

    def gated_layer(a, b, wa_ref, wb_ref, bias_ref):
        a = a.astype(operand_dtype)
        b = b.astype(operand_dtype)
        # cat(a, b) @ W.T computed as a @ W_a + b @ W_b (pre-split row blocks).
        pre = (jnp.dot(a, wa_ref[...], preferred_element_type=jnp.float32)
               + jnp.dot(b, wb_ref[...], preferred_element_type=jnp.float32)
               + bias_ref[...])
        # sigmoid(z) == 0.5 * tanh(z/2) + 0.5; the z/2 is pre-folded into the
        # packed gate columns, so one tanh over [tb, 2*hp] covers both halves
        # (single EUP pass, no logistic / divide).
        t = jnp.tanh(pre)
        return t[:, :hp] * (0.5 * t[:, hp:] + 0.5)

    # layer 1: cat(hidden, input1) -> tanh * sigmoid
    h1 = gated_layer(hidden_ref[...], in1_ref[...], w1h_ref, w1i_ref, b1_ref)

    # TODO(synk): dropout is identity in eval mode; training-mode dropout not implemented.

    # layer 2: cat(h1, input2) -> tanh * sigmoid
    out = gated_layer(h1, in2_ref[...], w2h_ref, w2i_ref, b2_ref)
    out_ref[...] = out.astype(out_ref.dtype)


def pack_gatenn_params(params, hidden_dim, *, weight_dtype=jnp.float32):
    """One-time packing (do this at parameter-load time, NOT per call).

    PyTorch Linear: y = x @ W.T + b with W: [out, in]; x = cat(a, b) where the
    `a` part is `hidden` (layer 1) / `h1` (layer 2).  Per layer we build
      w*h : [Ka, 2*Hp]  rows for the a-part, cols = [tanh-path | 0.5*gate-path]
      w*i : [Kb, 2*Hp]  rows for the b-part (input1 / input2)
      b*  : [1,  2*Hp]  (gate half pre-scaled by 0.5)
    with Hp = round_up(H, 128) so each column half is lane-dense.  Padded columns
    are zero => padded outputs are tanh(0)*gate = 0, so layer-2 a-rows padded to
    Hp contribute nothing and the wrapper can simply slice [:, :H].
    """
    H = hidden_dim
    Hp = _round_up(max(H, 128), 128)

    def pad_cols(x):                      # [rows, H] -> [rows, Hp]
        return jnp.pad(x, ((0, 0), (0, Hp - x.shape[1])))

    def pack(wh, wg, bh, bg, pad_a_rows_to=None):
        wa = jnp.concatenate([pad_cols(wh[:, :H].T),
                              pad_cols(0.5 * wg[:, :H].T)], axis=1)   # [H,  2Hp]
        wb = jnp.concatenate([pad_cols(wh[:, H:].T),
                              pad_cols(0.5 * wg[:, H:].T)], axis=1)   # [Kb, 2Hp]
        if pad_a_rows_to is not None:
            wa = jnp.pad(wa, ((0, pad_a_rows_to - wa.shape[0]), (0, 0)))
        bias = jnp.concatenate([jnp.pad(bh, (0, Hp - H)),
                                jnp.pad(0.5 * bg, (0, Hp - H))]).reshape(1, 2 * Hp)
        return (wa.astype(weight_dtype), wb.astype(weight_dtype),
                bias.astype(jnp.float32))

    wh1, bh1 = params["hidden_l1"]
    wg1, bg1 = params["gate_l1"]
    wh2, bh2 = params["hidden_l2"]
    wg2, bg2 = params["gate_l2"]

    w1h, w1i, b1 = pack(wh1, wg1, bh1, bg1)
    w2h, w2i, b2 = pack(wh2, wg2, bh2, bg2, pad_a_rows_to=Hp)
    return {"w1h": w1h, "w1i": w1i, "b1": b1,
            "w2h": w2h, "w2i": w2i, "b2": b2}


def gatenn_forward(hidden, input1, input2, packed, *, batch_tile=1024):
    """hidden: [B, H], input1: [B, I1], input2: [B, I2] -> [B, H]."""
    B, H = hidden.shape
    I1 = input1.shape[-1]
    I2 = input2.shape[-1]
    Hp = packed["w1h"].shape[-1] // 2          # static under jit
    operand_dtype = packed["w1h"].dtype        # f32 or bf16 MXU operands

    # Big batch tiles amortize per-step pipeline overhead; if a single step would
    # cover everything but the batch is large enough, split it so both v7x
    # TensorCores (the "parallel" grid axis) get work.
    tb = min(batch_tile, B)
    if pl.cdiv(B, tb) == 1 and B > 16:
        tb = _round_up(pl.cdiv(B, 2), 8)
    nb = pl.cdiv(B, tb)

    kernel = functools.partial(gatenn_kernel, hp=Hp, operand_dtype=operand_dtype)

    def resident(a):
        # Weights / biases: whole array VMEM-resident, same block every step.
        return pl.BlockSpec(a.shape, lambda i: (0, 0))

    out_padded = pl.pallas_call(
        kernel,
        out_shape=jax.ShapeDtypeStruct((B, Hp), hidden.dtype),
        grid=(nb,),
        in_specs=[
            pl.BlockSpec((tb, H), lambda i: (i, 0)),    # hidden  (streamed)
            pl.BlockSpec((tb, I1), lambda i: (i, 0)),   # input1  (streamed)
            pl.BlockSpec((tb, I2), lambda i: (i, 0)),   # input2  (streamed)
            resident(packed["w1h"]), resident(packed["w1i"]), resident(packed["b1"]),
            resident(packed["w2h"]), resident(packed["w2i"]), resident(packed["b2"]),
        ],
        # Hp is a multiple of 128 -> unmasked, lane-dense output stores.
        out_specs=pl.BlockSpec((tb, Hp), lambda i: (i, 0)),
        compiler_params=pltpu.CompilerParams(
            dimension_semantics=("parallel",),
            # Explicit cap: above v5e's 16 MiB scoped default, well inside v7x's
            # 64 MiB physical VMEM even with double-buffered 1024-row tiles.
            vmem_limit_bytes=32 << 20,
        ),
    )(hidden, input1, input2,
      packed["w1h"], packed["w1i"], packed["b1"],
      packed["w2h"], packed["w2i"], packed["b2"])

    # Padded lanes are exactly zero (tanh(0) * gate == 0); drop them.
    return out_padded[:, :H]


gatenn_forward_jit = jax.jit(gatenn_forward, static_argnames=("batch_tile",))


def _init_linear(key, out_dim, in_dim):
    # Deterministic, PyTorch-Linear-like uniform(-1/sqrt(in), 1/sqrt(in)) init.
    kw, kb = jax.random.split(key)
    bound = 1.0 / jnp.sqrt(jnp.float32(in_dim))
    w = jax.random.uniform(kw, (out_dim, in_dim), jnp.float32, -bound, bound)
    b = jax.random.uniform(kb, (out_dim,), jnp.float32, -bound, bound)
    return w, b


def _reference(hidden, input1, input2, params):
    wh1, bh1 = params["hidden_l1"]
    wg1, bg1 = params["gate_l1"]
    wh2, bh2 = params["hidden_l2"]
    wg2, bg2 = params["gate_l2"]
    x1 = jnp.concatenate([hidden, input1], axis=-1)
    h = jnp.tanh(x1 @ wh1.T + bh1) * jax.nn.sigmoid(x1 @ wg1.T + bg1)
    x2 = jnp.concatenate([h, input2], axis=-1)
    return jnp.tanh(x2 @ wh2.T + bh2) * jax.nn.sigmoid(x2 @ wg2.T + bg2)


if __name__ == "__main__":
    B, hidden_dim, input1_dim, input2_dim = 8, 32, 48, 16

    key = jax.random.PRNGKey(0)
    k_hid, k_in1, k_in2, k1, k2, k3, k4 = jax.random.split(key, 7)

    hidden = jax.random.normal(k_hid, (B, hidden_dim), jnp.float32)
    input1 = jax.random.normal(k_in1, (B, input1_dim), jnp.float32)
    input2 = jax.random.normal(k_in2, (B, input2_dim), jnp.float32)

    raw_params = {
        "hidden_l1": _init_linear(k1, hidden_dim, input1_dim + hidden_dim),
        "gate_l1":   _init_linear(k2, hidden_dim, input1_dim + hidden_dim),
        "hidden_l2": _init_linear(k3, hidden_dim, input2_dim + hidden_dim),
        "gate_l2":   _init_linear(k4, hidden_dim, input2_dim + hidden_dim),
    }

    ref = _reference(hidden, input1, input2, raw_params)

    # f32 path: exact-rewrite packing (sigmoid-as-tanh is mathematically exact).
    packed = jax.tree.map(jax.block_until_ready,
                          pack_gatenn_params(raw_params, hidden_dim))
    out = jax.block_until_ready(gatenn_forward_jit(hidden, input1, input2, packed))
    assert out.shape == (B, hidden_dim)
    assert jnp.allclose(out, ref, atol=1e-5, rtol=1e-5)

    # bf16 MXU-operand path (v6e/v7x fast path): weights stored bf16, streamed
    # activations cast in-kernel; accumulation + epilogue stay f32 (v5e-safe).
    packed_bf16 = jax.tree.map(
        jax.block_until_ready,
        pack_gatenn_params(raw_params, hidden_dim, weight_dtype=jnp.bfloat16))
    out_bf16 = jax.block_until_ready(
        gatenn_forward_jit(hidden, input1, input2, packed_bf16))
    assert out_bf16.shape == (B, hidden_dim)
    assert jnp.allclose(out_bf16, ref, atol=5e-2, rtol=5e-2)

    print("KERNEL_OK")
</pallas_src>

<mosaic_0001>
module attributes {stable_mosaic.version = 11 : i64} {
  func.func @gatenn_kernel(%arg0: i32, %arg1: memref<8x32xf32, #tpu.memory_space<vmem>>, %arg2: memref<8x48xf32, #tpu.memory_space<vmem>>, %arg3: memref<8x16xf32, #tpu.memory_space<vmem>>, %arg4: memref<32x256xf32, #tpu.memory_space<vmem>>, %arg5: memref<48x256xf32, #tpu.memory_space<vmem>>, %arg6: memref<1x256xf32, #tpu.memory_space<vmem>>, %arg7: memref<128x256xf32, #tpu.memory_space<vmem>>, %arg8: memref<16x256xf32, #tpu.memory_space<vmem>>, %arg9: memref<1x256xf32, #tpu.memory_space<vmem>>, %arg10: memref<8x128xf32, #tpu.memory_space<vmem>>) attributes {dimension_semantics = [#tpu.dimension_semantics<parallel>], iteration_bounds = array<i64: 1>, scalar_prefetch = 0 : i64, scratch_operands = 0 : i64, tpu.core_type = #tpu.core_type<tc>, window_params = [{transform_indices = @transform_0, window_bounds = array<i64: 8, 32>}, {transform_indices = @transform_1, window_bounds = array<i64: 8, 48>}, {transform_indices = @transform_2, window_bounds = array<i64: 8, 16>}, {pipeline_mode = #tpu.pipeline_mode<synchronous>, transform_indices = @transform_3, window_bounds = array<i64: 32, 256>}, {pipeline_mode = #tpu.pipeline_mode<synchronous>, transform_indices = @transform_4, window_bounds = array<i64: 48, 256>}, {pipeline_mode = #tpu.pipeline_mode<synchronous>, transform_indices = @transform_5, window_bounds = array<i64: 1, 256>}, {pipeline_mode = #tpu.pipeline_mode<synchronous>, transform_indices = @transform_6, window_bounds = array<i64: 128, 256>}, {pipeline_mode = #tpu.pipeline_mode<synchronous>, transform_indices = @transform_7, window_bounds = array<i64: 16, 256>}, {pipeline_mode = #tpu.pipeline_mode<synchronous>, transform_indices = @transform_8, window_bounds = array<i64: 1, 256>}, {transform_indices = @transform_9, window_bounds = array<i64: 8, 128>}]} {
    %c0 = arith.constant 0 : index
    %c0_0 = arith.constant 0 : index
    %0 = vector.load %arg1[%c0, %c0_0] : memref<8x32xf32, #tpu.memory_space<vmem>>, vector<8x32xf32>
    %c0_1 = arith.constant 0 : index
    %c0_2 = arith.constant 0 : index
    %1 = vector.load %arg2[%c0_1, %c0_2] : memref<8x48xf32, #tpu.memory_space<vmem>>, vector<8x48xf32>
    %c0_3 = arith.constant 0 : index
    %c0_4 = arith.constant 0 : index
    %2 = vector.load %arg4[%c0_3, %c0_4] : memref<32x256xf32, #tpu.memory_space<vmem>>, vector<32x256xf32>
    %cst = arith.constant dense<0.000000e+00> : vector<8x256xf32>
    %3 = tpu.matmul %0, %2, %cst {dimension_numbers = #tpu.dot_dimension_numbers<[1], [0], [0], [1], [0, 0, 1, 1], [], []>} : vector<8x32xf32>, vector<32x256xf32>, vector<8x256xf32> -> vector<8x256xf32>
    %c0_5 = arith.constant 0 : index
    %c0_6 = arith.constant 0 : index
    %4 = vector.load %arg5[%c0_5, %c0_6] : memref<48x256xf32, #tpu.memory_space<vmem>>, vector<48x256xf32>
    %cst_7 = arith.constant dense<0.000000e+00> : vector<8x256xf32>
    %5 = tpu.matmul %1, %4, %cst_7 {dimension_numbers = #tpu.dot_dimension_numbers<[1], [0], [0], [1], [0, 0, 1, 1], [], []>} : vector<8x48xf32>, vector<48x256xf32>, vector<8x256xf32> -> vector<8x256xf32>
    %6 = arith.addf %3, %5 : vector<8x256xf32>
    %c0_8 = arith.constant 0 : index
    %c0_9 = arith.constant 0 : index
    %7 = vector.load %arg6[%c0_8, %c0_9] : memref<1x256xf32, #tpu.memory_space<vmem>>, vector<1x256xf32>
    %8 = vector.broadcast %7 : vector<1x256xf32> to vector<8x256xf32>
    %9 = arith.addf %6, %8 : vector<8x256xf32>
    %10 = math.tanh %9 : vector<8x256xf32>
    %11 = vector.extract_strided_slice %10 {offsets = [0, 0], sizes = [8, 128], strides = [1, 1]} : vector<8x256xf32> to vector<8x128xf32>
    %12 = vector.extract_strided_slice %10 {offsets = [0, 128], sizes = [8, 128], strides = [1, 1]} : vector<8x256xf32> to vector<8x128xf32>
    %cst_10 = arith.constant 5.000000e-01 : f32
    %13 = vector.broadcast %cst_10 : f32 to vector<8x128xf32>
    %14 = arith.mulf %13, %12 : vector<8x128xf32>
    %cst_11 = arith.constant 5.000000e-01 : f32
    %15 = vector.broadcast %cst_11 : f32 to vector<8x128xf32>
    %16 = arith.addf %14, %15 : vector<8x128xf32>
    %17 = arith.mulf %11, %16 : vector<8x128xf32>
    %c0_12 = arith.constant 0 : index
    %c0_13 = arith.constant 0 : index
    %18 = vector.load %arg3[%c0_12, %c0_13] : memref<8x16xf32, #tpu.memory_space<vmem>>, vector<8x16xf32>
    %c0_14 = arith.constant 0 : index
    %c0_15 = arith.constant 0 : index
    %19 = vector.load %arg7[%c0_14, %c0_15] : memref<128x256xf32, #tpu.memory_space<vmem>>, vector<128x256xf32>
    %cst_16 = arith.constant dense<0.000000e+00> : vector<8x256xf32>
    %20 = tpu.matmul %17, %19, %cst_16 {dimension_numbers = #tpu.dot_dimension_numbers<[1], [0], [0], [1], [0, 0, 1, 1], [], []>} : vector<8x128xf32>, vector<128x256xf32>, vector<8x256xf32> -> vector<8x256xf32>
    %c0_17 = arith.constant 0 : index
    %c0_18 = arith.constant 0 : index
    %21 = vector.load %arg8[%c0_17, %c0_18] : memref<16x256xf32, #tpu.memory_space<vmem>>, vector<16x256xf32>
    %cst_19 = arith.constant dense<0.000000e+00> : vector<8x256xf32>
    %22 = tpu.matmul %18, %21, %cst_19 {dimension_numbers = #tpu.dot_dimension_numbers<[1], [0], [0], [1], [0, 0, 1, 1], [], []>} : vector<8x16xf32>, vector<16x256xf32>, vector<8x256xf32> -> vector<8x256xf32>
    %23 = arith.addf %20, %22 : vector<8x256xf32>
    %c0_20 = arith.constant 0 : index
    %c0_21 = arith.constant 0 : index
    %24 = vector.load %arg9[%c0_20, %c0_21] : memref<1x256xf32, #tpu.memory_space<vmem>>, vector<1x256xf32>
    %25 = vector.broadcast %24 : vector<1x256xf32> to vector<8x256xf32>
    %26 = arith.addf %23, %25 : vector<8x256xf32>
    %27 = math.tanh %26 : vector<8x256xf32>
    %28 = vector.extract_strided_slice %27 {offsets = [0, 0], sizes = [8, 128], strides = [1, 1]} : vector<8x256xf32> to vector<8x128xf32>
    %29 = vector.extract_strided_slice %27 {offsets = [0, 128], sizes = [8, 128], strides = [1, 1]} : vector<8x256xf32> to vector<8x128xf32>
    %cst_22 = arith.constant 5.000000e-01 : f32
    %30 = vector.broadcast %cst_22 : f32 to vector<8x128xf32>
    %31 = arith.mulf %30, %29 : vector<8x128xf32>
    %cst_23 = arith.constant 5.000000e-01 : f32
    %32 = vector.broadcast %cst_23 : f32 to vector<8x128xf32>
    %33 = arith.addf %31, %32 : vector<8x128xf32>
    %34 = arith.mulf %28, %33 : vector<8x128xf32>
    %c0_24 = arith.constant 0 : index
    %c0_25 = arith.constant 0 : index
    %35 = vector.load %arg10[%c0_24, %c0_25] : memref<8x128xf32, #tpu.memory_space<vmem>>, vector<8x128xf32>
    tpu.vector_store %arg10[%c0_24, %c0_25], %34 {strides = array<i32>} : memref<8x128xf32, #tpu.memory_space<vmem>>, vector<8x128xf32>,
    return
  }
  func.func @transform_0(%arg0: i32) -> (i32, i32) {
    %c0_i32 = arith.constant 0 : i32
    %c0_i32_0 = arith.constant 0 : i32
    return %arg0, %c0_i32 : i32, i32
  }
  func.func @transform_1(%arg0: i32) -> (i32, i32) {
    %c0_i32 = arith.constant 0 : i32
    %c0_i32_0 = arith.constant 0 : i32
    return %arg0, %c0_i32 : i32, i32
  }
  func.func @transform_2(%arg0: i32) -> (i32, i32) {
    %c0_i32 = arith.constant 0 : i32
    %c0_i32_0 = arith.constant 0 : i32
    return %arg0, %c0_i32 : i32, i32
  }
  func.func @transform_3(%arg0: i32) -> (i32, i32) {
    %c0_i32 = arith.constant 0 : i32
    %c0_i32_0 = arith.constant 0 : i32
    %c0_i32_1 = arith.constant 0 : i32
    return %c0_i32, %c0_i32_0 : i32, i32
  }
  func.func @transform_4(%arg0: i32) -> (i32, i32) {
    %c0_i32 = arith.constant 0 : i32
    %c0_i32_0 = arith.constant 0 : i32
    %c0_i32_1 = arith.constant 0 : i32
    return %c0_i32, %c0_i32_0 : i32, i32
  }
  func.func @transform_5(%arg0: i32) -> (i32, i32) {
    %c0_i32 = arith.constant 0 : i32
    %c0_i32_0 = arith.constant 0 : i32
    %c0_i32_1 = arith.constant 0 : i32
    return %c0_i32, %c0_i32_0 : i32, i32
  }
  func.func @transform_6(%arg0: i32) -> (i32, i32) {
    %c0_i32 = arith.constant 0 : i32
    %c0_i32_0 = arith.constant 0 : i32
    %c0_i32_1 = arith.constant 0 : i32
    return %c0_i32, %c0_i32_0 : i32, i32
  }
  func.func @transform_7(%arg0: i32) -> (i32, i32) {
    %c0_i32 = arith.constant 0 : i32
    %c0_i32_0 = arith.constant 0 : i32
    %c0_i32_1 = arith.constant 0 : i32
    return %c0_i32, %c0_i32_0 : i32, i32
  }
  func.func @transform_8(%arg0: i32) -> (i32, i32) {
    %c0_i32 = arith.constant 0 : i32
    %c0_i32_0 = arith.constant 0 : i32
    %c0_i32_1 = arith.constant 0 : i32
    return %c0_i32, %c0_i32_0 : i32, i32
  }
  func.func @transform_9(%arg0: i32) -> (i32, i32) {
    %c0_i32 = arith.constant 0 : i32
    %c0_i32_0 = arith.constant 0 : i32
    return %arg0, %c0_i32 : i32, i32
  }
}

</mosaic_0001>

<bundles_post_ra>
// kernel: gatenn_forward.1
= control target key start
LH: loop header
LB: loop body
LE: loop exit
PB: predicated region body
PF: predicated region fallthrough
CT: control target
= control target key end

     0   :  { %14 = vsyncpa [#allocation3], 0  ;;  %s995_s0 = inlined_call_operand.hbm [shape: f32[8,32], index: 0, kind: input, shape index: {}]   ;;  %s996_s1 = inlined_call_operand.hbm [shape: f32[8,48], index: 1, kind: input, shape index: {}]   ;;  %s997_s2 = inlined_call_operand.hbm [shape: f32[8,16], index: 2, kind: input, shape index: {}]   ;;  %s998_s3 = inlined_call_operand.hbm [shape: f32[32,256], index: 3, kind: input, shape index: {}]   ;;  %s999_s4 = inlined_call_operand.hbm [shape: f32[48,256], index: 4, kind: input, shape index: {}]   ;;  %s1000_s5 = inlined_call_operand.vmem [shape: f32[1,256], index: 5, kind: input, shape index: {}]   ;;  %s1001_s6 = inlined_call_operand.hbm [shape: f32[128,256], index: 6, kind: input, shape index: {}]   ;;  %s1002_s7 = inlined_call_operand.hbm [shape: f32[16,256], index: 7, kind: input, shape index: {}]   ;;  %s1003_s8 = inlined_call_operand.vmem [shape: f32[1,256], index: 8, kind: input, shape index: {}]   ;;  %s1004_s9 = inlined_call_operand.hbm [shape: f32[8,128], index: 9, kind: output, shape index: {}]  }
   0x1   :  { %15 = vsyncpa [#allocation6], 0 }
   0x2   :  { %16 = vsyncpa [#allocation9], 0 }
   0x3   :  { %17 = vsyncpa [#allocation12], 0 }
   0x4   :  { %18 = vsyncpa [#allocation4], 0  ;;  %s802_s30 = smov [#allocation5]   ;;  %s803_s11 = smov [#allocation8]  }
   0x5   :  { %s35_s10 = sshll.u32 %s802_s30, 4  ;;  %s54_s12 = sshll.u32 %s803_s11, 4  ;;  %s36_s10 = int_to_ptr.vmem [resolvable:$true] %s35_s10  ;;  %s863_s12 = int_to_ptr.vmem [resolvable:$true] %s54_s12 }
   0x6   :  { %s616_s15 = scalar_lea.hbm %s996_s1, 128 }
   0x7   :  { %p617_p0 = scmp.ne.s32.totalorder %s996_s1, %s616_s15  ;;  %p620_p1 = scmp.lt.u32.totalorder %s616_s15, %s996_s1 }
   0x9   :  { %p622_p2 = pnand %p620_p1, %p617_p0 }
   0xb   :  { %625 = shalt.err (!%p622_p2)
}
   0xc   :  { %s626_s20 = scalar_lea.vmem %s36_s10, 128  ;;  %p631_p4 = scmp.lt.s32.totalorder %s36_s10, %s36_s10 }
   0xd   :  { %p627_p3 = scmp.ne.s32.totalorder %s36_s10, %s626_s20  ;;  %p632_p5 = scmp.lt.s32.totalorder %s626_s20, %s626_s20 }
   0xf   :  { %p633_p6 = por %p632_p5, %p631_p4 }
  0x11   :  { %p634_p7 = pnand %p633_p6, %p627_p3 }
  0x13   :  { %637 = shalt.err (!%p634_p7)
}
  0x14   :  { %38 = dma.hbm_to_vmem [thread:$0]  %s996_s1, 128, %s36_s10, [#allocation6]  }
  0x15   :  { %s638_s25 = scalar_lea.hbm %s998_s3, 1024 }
  0x16   :  { %p639_p8 = scmp.ne.s32.totalorder %s998_s3, %s638_s25  ;;  %p642_p9 = scmp.lt.u32.totalorder %s638_s25, %s998_s3 }
  0x18   :  { %p644_p10 = pnand %p642_p9, %p639_p8 }
  0x1a   :  { %647 = shalt.err (!%p644_p10)
}
  0x1b   :  { %s648_s30 = scalar_lea.vmem %s863_s12, 1024  ;;  %p653_p12 = scmp.lt.s32.totalorder %s863_s12, %s863_s12 }
  0x1c   :  { %p649_p11 = scmp.ne.s32.totalorder %s863_s12, %s648_s30  ;;  %p654_p13 = scmp.lt.s32.totalorder %s648_s30, %s648_s30 }
  0x1e   :  { %p655_p0 = por %p654_p13, %p653_p12 }
  0x20   :  { %p656_p1 = pnand %p655_p0, %p649_p11 }
  0x22   :  { %659 = shalt.err (!%p656_p1)
}
  0x23   :  { %s804_s1 = smov 256   ;;  %s805_s10 = smov 16  }
  0x24   :  { %60 = dma.hbm_to_vmem [thread:$0]  %s998_s3, 1024, %s863_s12, [#allocation9], %s804_s1, %s804_s1, %s805_s10  }
  0x25   :  { %s806_s14 = smov [#allocation11]   ;;  %s807_s16 = smov [#allocation2]  }
  0x26   :  { %s80_s15 = sshll.u32 %s806_s14, 4  ;;  %s25_s17 = sshll.u32 %s807_s16, 4  ;;  %s81_s15 = int_to_ptr.vmem [resolvable:$true] %s80_s15  ;;  %s26_s17 = int_to_ptr.vmem [resolvable:$true] %s25_s17 }
  0x27   :  { %s660_s20 = scalar_lea.hbm %s1001_s6, 4096 }
  0x28   :  { %p661_p2 = scmp.ne.s32.totalorder %s1001_s6, %s660_s20  ;;  %p664_p3 = scmp.lt.u32.totalorder %s660_s20, %s1001_s6 }
  0x2a   :  { %p666_p4 = pnand %p664_p3, %p661_p2 }
  0x2c   :  { %669 = shalt.err (!%p666_p4)
}
  0x2d   :  { %s670_s3 = scalar_lea.vmem %s81_s15, 4096  ;;  %p675_p6 = scmp.lt.s32.totalorder %s81_s15, %s81_s15 }
  0x2e   :  { %p671_p5 = scmp.ne.s32.totalorder %s81_s15, %s670_s3  ;;  %p676_p7 = scmp.lt.s32.totalorder %s670_s3, %s670_s3 }
  0x30   :  { %p677_p8 = por %p676_p7, %p675_p6 }
  0x32   :  { %p678_p9 = pnand %p677_p8, %p671_p5 }
  0x34   :  { %681 = shalt.err (!%p678_p9)
}
  0x35   :  { %86 = dma.hbm_to_vmem [thread:$0]  %s1001_s6, 4096, %s81_s15, [#allocation12], %s804_s1, %s804_s1, %s805_s10  }
  0x36   :  { %s682_s28 = scalar_lea.hbm %s995_s0, 128 }
  0x37   :  { %p683_p10 = scmp.ne.s32.totalorder %s995_s0, %s682_s28  ;;  %p686_p11 = scmp.lt.u32.totalorder %s682_s28, %s995_s0 }
  0x39   :  { %p688_p12 = pnand %p686_p11, %p683_p10 }
  0x3b   :  { %691 = shalt.err (!%p688_p12)
}
  0x3c   :  { %s692_s14 = scalar_lea.vmem %s26_s17, 128  ;;  %p697_p0 = scmp.lt.s32.totalorder %s26_s17, %s26_s17 }
  0x3d   :  { %p693_p13 = scmp.ne.s32.totalorder %s26_s17, %s692_s14  ;;  %p698_p1 = scmp.lt.s32.totalorder %s692_s14, %s692_s14 }
  0x3f   :  { %p699_p2 = por %p698_p1, %p697_p0 }
  0x41   :  { %p700_p3 = pnand %p699_p2, %p693_p13 }
  0x43   :  { %703 = shalt.err (!%p700_p3)
}
  0x44   :  { %28 = dma.hbm_to_vmem [thread:$0]  %s995_s0, 128, %s26_s17, [#allocation3]  }
  0x45   :  { %s808_s16 = smov [#allocation7]   ;;  %s809_s19 = smov [#allocation10]  }
  0x46   :  { %s45_s18 = sshll.u32 %s808_s16, 4  ;;  %s66_s20 = sshll.u32 %s809_s19, 4  ;;  %s46_s18 = int_to_ptr.vmem [resolvable:$true] %s45_s18  ;;  %s924_s20 = int_to_ptr.vmem [resolvable:$true] %s66_s20 }
  0x47   :  { %s704_s23 = scalar_lea.hbm %s997_s2, 128 }
  0x48   :  { %p705_p4 = scmp.ne.s32.totalorder %s997_s2, %s704_s23  ;;  %p708_p5 = scmp.lt.u32.totalorder %s704_s23, %s997_s2 }
  0x4a   :  { %p710_p6 = pnand %p708_p5, %p705_p4 }
  0x4c   :  { %713 = shalt.err (!%p710_p6)
}
  0x4d   :  { %s714_s0 = scalar_lea.vmem %s46_s18, 128  ;;  %p719_p8 = scmp.lt.s32.totalorder %s46_s18, %s46_s18 }
  0x4e   :  { %p715_p7 = scmp.ne.s32.totalorder %s46_s18, %s714_s0  ;;  %p720_p9 = scmp.lt.s32.totalorder %s714_s0, %s714_s0 }
  0x50   :  { %p721_p10 = por %p720_p9, %p719_p8 }
  0x52   :  { %p722_p11 = pnand %p721_p10, %p715_p7 }
  0x54   :  { %725 = shalt.err (!%p722_p11)
}
  0x55   :  { %48 = dma.hbm_to_vmem [thread:$0]  %s997_s2, 128, %s46_s18, [#allocation6]  }
  0x56   :  { %s726_s29 = scalar_lea.hbm %s999_s4, 1536 }
  0x57   :  { %p727_p12 = scmp.ne.s32.totalorder %s999_s4, %s726_s29  ;;  %p730_p13 = scmp.lt.u32.totalorder %s726_s29, %s999_s4 }
  0x59   :  { %p732_p0 = pnand %p730_p13, %p727_p12 }
  0x5b   :  { %735 = shalt.err (!%p732_p0)
}
  0x5c   :  { %s736_s6 = scalar_lea.vmem %s924_s20, 1536  ;;  %p741_p2 = scmp.lt.s32.totalorder %s924_s20, %s924_s20 }
  0x5d   :  { %p737_p1 = scmp.ne.s32.totalorder %s924_s20, %s736_s6  ;;  %p742_p3 = scmp.lt.s32.totalorder %s736_s6, %s736_s6 }
  0x5f   :  { %p743_p4 = por %p742_p3, %p741_p2 }
  0x61   :  { %p744_p5 = pnand %p743_p4, %p737_p1 }
  0x63   :  { %747 = shalt.err (!%p744_p5)
}
  0x64   :  { %72 = dma.hbm_to_vmem [thread:$0]  %s999_s4, 1536, %s924_s20, [#allocation9], %s804_s1, %s804_s1, %s805_s10  }
  0x65   :  { %s810_s16 = smov [#allocation13]   ;;  %s748_s22 = scalar_lea.hbm %s1002_s7, 512 }
  0x66   :  { %s92_s18 = sshll.u32 %s810_s16, 4  ;;  %p749_p6 = scmp.ne.s32.totalorder %s1002_s7, %s748_s22  ;;  %s93_s18 = int_to_ptr.vmem [resolvable:$true] %s92_s18 }
  0x67   :  { %p752_p7 = scmp.lt.u32.totalorder %s748_s22, %s1002_s7 }
  0x69   :  { %p754_p8 = pnand %p752_p7, %p749_p6 }
  0x6b   :  { %757 = shalt.err (!%p754_p8)
}
  0x6c   :  { %s758_s25 = scalar_lea.vmem %s93_s18, 512  ;;  %p763_p10 = scmp.lt.s32.totalorder %s93_s18, %s93_s18 }
  0x6d   :  { %p759_p9 = scmp.ne.s32.totalorder %s93_s18, %s758_s25  ;;  %p764_p11 = scmp.lt.s32.totalorder %s758_s25, %s758_s25 }
  0x6f   :  { %p765_p12 = por %p764_p11, %p763_p10 }
  0x71   :  { %p766_p13 = pnand %p765_p12, %p759_p9 }
  0x73   :  { %769 = shalt.err (!%p766_p13)
}
  0x74   :  { %98 = dma.hbm_to_vmem [thread:$0]  %s1002_s7, 512, %s93_s18, [#allocation12], %s804_s1, %s804_s1, %s805_s10  }
  0x75   :  { %792 = dma.done.wait [#allocation3], 128  }
  0x76   :  { %793 = vsyncadd [#allocation3], 4294967168 }
  0x77   :  { %794 = dma.done.wait [#allocation6], 256  }
  0x78   :  { %795 = vsyncadd [#allocation6], 4294967040 }
  0x79   :  { %796 = dma.done.wait [#allocation9], 2560  }
  0x7a   :  { %797 = vsyncadd [#allocation9], 4294964736 }
  0x7b   :  { %798 = dma.done.wait [#allocation12], 4608  }
  0x7c   :  { %799 = vsyncadd [#allocation12], 4294962688  ;;  %v811_v0 = vmov 0.0   ;;  %v133_v1 = vld [vmem:[#allocation10 + $0x8] sm:$0xff]  ;;  %v135_v2 = vld [vmem:[#allocation10 + $0x18] sm:$0xff]  ;;  %vm144_vm0 = vcmask 392192  }
  0x7d   :  { %212 = vmatprep.mubr.f32.mxu0 %v811_v0  ;;  %489 = vmatprep.mubr.f32.mxu1 %v811_v0  ;;  %v132_v3 = vld [vmem:[#allocation10] sm:$0xff]  ;;  %v537_v4 = vpack.c.bf16 %v135_v2, %v133_v1  ;;  %v134_v5 = vld [vmem:[#allocation10 + $0x10] sm:$0xff]  ;;  %v137_v6 = vld [vmem:[#allocation10 + $0x28] sm:$0xff]  ;;  %vm219_vm1 = vcmask 261120   ;;  %vm350_vm2 = vcmask 130048  }
  0x7e   :  { %v139_v7 = vld [vmem:[#allocation10 + $0x38] sm:$0xff]  ;;  %v539_v8 = vpack.c.bf16 %v134_v5, %v132_v3  ;;  %v136_v10 = vld [vmem:[#allocation10 + $0x20] sm:$0xff]  ;;  %v138_v11 = vld [vmem:[#allocation10 + $0x30] sm:$0xff] }
  0x7f   :  { %v541_v9 = vpack.c.bf16 %v139_v7, %v137_v6  ;;  %v141_v12 = vld [vmem:[#allocation10 + $0x48] sm:$0xff]  ;;  %538 = vmatprep.subr.bf16.mxu0 %v537_v4  ;;  %v143_v13 = vld [vmem:[#allocation10 + $0x58] sm:$0xff]  ;;  %v543_v14 = vpack.c.bf16 %v138_v11, %v136_v10  ;;  %v140_v16 = vld [vmem:[#allocation10 + $0x40] sm:$0xff] }
  0x80   :  { %540 = vmatpush1.bf16.msra.mxu0 %v539_v8  ;;  %v545_v15 = vpack.c.bf16 %v143_v13, %v141_v12  ;;  %v142_v17 = vld [vmem:[#allocation10 + $0x50] sm:$0xff]  ;;  %v125_v18 = vld [vmem:[#allocation8 + $0x8] sm:$0xff]  ;;  %v127_v19 = vld [vmem:[#allocation8 + $0x18] sm:$0xff] }
  0x81   :  { %542 = vmatprep.subr.bf16.mxu0 %v541_v9  ;;  %v124_v20 = vld [vmem:[#allocation8] sm:$0xff]  ;;  %v126_v21 = vld [vmem:[#allocation8 + $0x10] sm:$0xff]  ;;  %v315_v22 = vld [vmem:[#allocation11 + $0x8] sm:$0xff]  ;;  %v547_v24 = vpack.c.bf16 %v142_v17, %v140_v16  ;;  %v549_v30 = vpack.c.bf16 %v127_v19, %v125_v18 }
  0x82   :  { %v317_v23 = vld [vmem:[#allocation11 + $0x18] sm:$0xff]  ;;  %v129_v25 = vld [vmem:[#allocation8 + $0x28] sm:$0xff]  ;;  %v314_v27 = vld [vmem:[#allocation11] sm:$0xff]  ;;  %v551_v41 = vpack.c.bf16 %v126_v21, %v124_v20 }
  0x83   :  { %v561_v26 = vpack.c.bf16 %v317_v23, %v315_v22  ;;  %v316_v28 = vld [vmem:[#allocation11 + $0x10] sm:$0xff]  ;;  %v319_v29 = vld [vmem:[#allocation11 + $0x28] sm:$0xff]  ;;  %v321_v32 = vld [vmem:[#allocation11 + $0x38] sm:$0xff] }
  0x84   :  { %544 = vmatpush1.bf16.msra.mxu0 %v543_v14  ;;  %v563_v31 = vpack.c.bf16 %v316_v28, %v314_v27  ;;  %v318_v33 = vld [vmem:[#allocation11 + $0x20] sm:$0xff]  ;;  %v320_v34 = vld [vmem:[#allocation11 + $0x30] sm:$0xff]  ;;  %v131_v35 = vld [vmem:[#allocation8 + $0x38] sm:$0xff]  ;;  %v565_v36 = vpack.c.bf16 %v321_v32, %v319_v29 }
  0x85   :  { %546 = vmatprep.subr.bf16.mxu0 %v545_v15  ;;  %562 = vmatprep.subr.bf16.mxu1 %v561_v26  ;;  %v323_v37 = vld [vmem:[#allocation11 + $0x48] sm:$0xff]  ;;  %v325_v38 = vld [vmem:[#allocation11 + $0x58] sm:$0xff]  ;;  %v567_v39 = vpack.c.bf16 %v320_v34, %v318_v33  ;;  %v123_v40 = vld [vmem:[#allocation5] sm:$0xff]  ;;  %v553_v44 = vpack.c.bf16 %v131_v35, %v129_v25 }
  0x86   :  { %564 = vmatpush1.bf16.msra.mxu1 %v563_v31  ;;  %v322_v42 = vld [vmem:[#allocation11 + $0x40] sm:$0xff]  ;;  %v324_v43 = vld [vmem:[#allocation11 + $0x50] sm:$0xff]  ;;  %v569_v47 = vpack.c.bf16 %v325_v38, %v323_v37  ;;  %v122_v50 = vld [vmem:[#allocation2] sm:$0xff] }
  0x87   :  { %566 = vmatprep.subr.bf16.mxu1 %v565_v36  ;;  %v128_v45 = vld [vmem:[#allocation8 + $0x20] sm:$0xff]  ;;  %v130_v46 = vld [vmem:[#allocation8 + $0x30] sm:$0xff]  ;;  %v571_v48 = vpack.c.bf16 %v324_v43, %v322_v42  ;;  %v327_v51 = vld [vmem:[#allocation11 + $0x68] sm:$0xff] }
  0x88   :  { %548 = vmatpush1.bf16.msra.mxu0 %v547_v24  ;;  %v555_v49 = vpack.c.bf16 %v130_v46, %v128_v45  ;;  %v329_v52 = vld [vmem:[#allocation11 + $0x78] sm:$0xff]  ;;  %v326_v54 = vld [vmem:[#allocation11 + $0x60] sm:$0xff]  ;;  %v328_v55 = vld [vmem:[#allocation11 + $0x70] sm:$0xff]  ;;  %v296_v24 = vlaneseq }
  0x89   :  { %550 = vmatprep.subr.bf16.mxu0 %v549_v30  ;;  %v573_v53 = vpack.c.bf16 %v329_v52, %v327_v51  ;;  %v575_v56 = vpack.c.bf16 %v328_v55, %v326_v54  ;;  %v331_v57 = vld [vmem:[#allocation11 + $0x88] sm:$0xff]  ;;  %v333_v58 = vld [vmem:[#allocation11 + $0x98] sm:$0xff]  ;;  %v330_v60 = vld [vmem:[#allocation11 + $0x80] sm:$0xff] }
  0x8a   :  { %568 = vmatpush1.bf16.msra.mxu1 %v567_v39  ;;  %v577_v59 = vpack.c.bf16 %v333_v58, %v331_v57  ;;  %v332_v61 = vld [vmem:[#allocation11 + $0x90] sm:$0xff]  ;;  %v335_v63 = vld [vmem:[#allocation11 + $0xa8] sm:$0xff]  ;;  %v337_v1 = vld [vmem:[#allocation11 + $0xb8] sm:$0xff]  ;;  %v297_v25 = vshrl.u32 %v296_v24, 7 }
  0x8b   :  { %534 = vmatmul.mubr.msk.f32.vlgmr.msra.gmra.mrb[0].mxu0 %vm144_vm0, %v123_v40  ;;  %570 = vmatprep.subr.bf16.mxu1 %v569_v47  ;;  %v579_v62 = vpack.c.bf16 %v332_v61, %v330_v60  ;;  %v581_v2 = vpack.c.bf16 %v337_v1, %v335_v63  ;;  %v336_v3 = vld [vmem:[#allocation11 + $0xb0] sm:$0xff]  ;;  %v339_v5 = vld [vmem:[#allocation11 + $0xc8] sm:$0xff]  ;;  %v341_v6 = vld [vmem:[#allocation11 + $0xd8] sm:$0xff] }
  0x8c   :  { %552 = vmatpush1.bf16.msra.mxu0 %v551_v41  ;;  %287 = vmatprep.mubr.f32.mxu0 %v811_v0  ;;  %v585_v7 = vpack.c.bf16 %v341_v6, %v339_v5  ;;  %v338_v8 = vld [vmem:[#allocation11 + $0xc0] sm:$0xff]  ;;  %v340_v9 = vld [vmem:[#allocation11 + $0xd0] sm:$0xff]  ;;  %v347_v11 = vld [vmem:[#allocation13 + $0x8] sm:$0xff]  ;;  %v302_v26 = vsub.s32 1, %v297_v25  ;;  %v298_v28 = vsub.s32 0, %v297_v25 }
  0x8d   :  { %554 = vmatprep.subr.bf16.mxu0 %v553_v44  ;;  %v587_v10 = vpack.c.bf16 %v340_v9, %v338_v8  ;;  %v349_v12 = vld [vmem:[#allocation13 + $0x18] sm:$0xff]  ;;  %v343_v14 = vld [vmem:[#allocation11 + $0xe8] sm:$0xff]  ;;  %v346_v16 = vld [vmem:[#allocation13] sm:$0xff] }
  0x8e   :  { %572 = vmatpush1.bf16.msra.mxu1 %v571_v48  ;;  %v557_v13 = vpack.c.bf16 %v349_v12, %v347_v11  ;;  %v345_v15 = vld [vmem:[#allocation11 + $0xf8] sm:$0xff]  ;;  %v348_v18 = vld [vmem:[#allocation13 + $0x10] sm:$0xff]  ;;  %v342_v19 = vld [vmem:[#allocation11 + $0xe0] sm:$0xff] }
  0x8f   :  { %574 = vmatprep.subr.bf16.mxu1 %v573_v53  ;;  %v589_v17 = vpack.c.bf16 %v345_v15, %v343_v14  ;;  %v344_v20 = vld [vmem:[#allocation11 + $0xf0] sm:$0xff]  ;;  %v559_v21 = vpack.c.bf16 %v348_v18, %v346_v16  ;;  %v313_v23 = vld [vmem:[#allocation7] sm:$0xff]  ;;  %v294_v27 = vld [vmem:[%s1000_s5] sm:$0x3]  ;;  %s812_s5 = smov [#allocation14]  }
  0x90   :  { %556 = vmatpush1.bf16.msra.mxu0 %v555_v49  ;;  %v591_v22 = vpack.c.bf16 %v344_v20, %v342_v19  ;;  %v303_v29 = vrot.slane %v294_v27, %v302_v26  ;;  %v299_v31 = vrot.slane %v294_v27, %v298_v28  ;;  %v496_v42 = vld [vmem:[%s1003_s8] sm:$0x3]  ;;  %s522_s17 = sshll.u32 %s812_s5, 4  ;;  %s523_s17 = int_to_ptr.vmem [resolvable:$true] %s522_s17 }
  0x91   :  { %558 = vmatprep.subr.bf16.mxu0 %v557_v13  ;;  %v505_v44 = vrot.slane %v496_v42, %v302_v26  ;;  %v501_v47 = vrot.slane %v496_v42, %v298_v28  ;;  %s770_s8 = scalar_lea.vmem %s523_s17, 128  ;;  %p775_p1 = scmp.lt.s32.totalorder %s523_s17, %s523_s17 }
  0x92   :  { %576 = vmatpush1.bf16.msra.mxu1 %v575_v56  ;;  %p771_p0 = scmp.ne.s32.totalorder %s523_s17, %s770_s8  ;;  %p776_p2 = scmp.lt.s32.totalorder %s770_s8, %s770_s8 }
  0x93   :  { %535 = vmatmul.mubr.msk.f32.vlgmr.msra.gmra.mrb[0].mxu0 %vm219_vm1, %v122_v50  ;;  %578 = vmatprep.subr.bf16.mxu1 %v577_v59 }
  0x94   :  { %418 = vmatprep.mubr.f32.mxu0 %v811_v0  ;;  %v334_v0 = vld [vmem:[#allocation11 + $0xa0] sm:$0xff]  ;;  %560 = vmatpush1.bf16.msra.mxu0 %v559_v21  ;;  %p777_p3 = por %p776_p2, %p775_p1 }
  0x95   :  { %v583_v4 = vpack.c.bf16 %v336_v3, %v334_v0 }
  0x96   :  { %580 = vmatpush1.bf16.msra.mxu1 %v579_v62  ;;  %p778_p4 = pnand %p777_p3, %p771_p0 }
  0x97   :  { %582 = vmatprep.subr.bf16.mxu1 %v581_v2  ;;  %536 = vmatmul.mubr.msk.f32.vlgmr.msra.gmra.mrb[2].mxu0 %vm350_vm2, %v313_v23 }
  0x9a   :  { %584 = vmatpush1.bf16.msra.mxu1 %v583_v4 }
  0x9b   :  { %586 = vmatprep.subr.bf16.mxu1 %v585_v7 }
  0x9e   :  { %588 = vmatpush1.bf16.msra.mxu1 %v587_v10 }
  0x9f   :  { %590 = vmatprep.subr.bf16.mxu1 %v589_v17 }
  0xa2   :  { %592 = vmatpush1.bf16.msra.mxu1 %v591_v22 }
 0x166   :  { %v289_v30 = vpop.f32.mrb[0].mxu0 }
 0x167   :  { %v291_v32 = vpop.f32.mrb[1].mxu0  ;;  %v306_v34 = vadd.f32 %v299_v31, %v289_v30 }
 0x168   :  { %v307_v33 = vadd.f32 %v303_v29, %v291_v32 }
 0x16a   :  { %608 = vtanh.f32 %v307_v33  ;;  %v420_v40 = vpop.f32.mrb[2].mxu0 }
 0x16b   :  { %610 = vtanh.f32 %v306_v34  ;;  %v422_v41 = vpop.f32.mrb[3].mxu0 }
 0x174   :  { %v609_v35 = vpop.eup %608 }
 0x175   :  { %v310_v36 = vmul.f32 0.5, %v609_v35  ;;  %v611_v38 = vpop.eup %610 }
 0x177   :  { %v311_v37 = vadd.f32 0.5, %v310_v36 }
 0x179   :  { %v312_v39 = vmul.f32 %v611_v38, %v311_v37 }
 0x17b   :  { %490 = vmatmul.mubr.f32.vlgmr.msra.gmra.mrb[0].mxu1 %v312_v39 }
 0x24e   :  { %v491_v43 = vpop.f32.mrb[0].mxu1 }
 0x24f   :  { %v492_v45 = vadd.f32 %v491_v43, %v420_v40  ;;  %v493_v46 = vpop.f32.mrb[1].mxu1 }
 0x250   :  { %v494_v48 = vadd.f32 %v493_v46, %v422_v41 }
 0x251   :  { %v508_v50 = vadd.f32 %v501_v47, %v492_v45 }
 0x252   :  { %v509_v49 = vadd.f32 %v505_v44, %v494_v48 }
 0x254   :  { %612 = vtanh.f32 %v509_v49 }
 0x255   :  { %614 = vtanh.f32 %v508_v50 }
 0x25e   :  { %v613_v51 = vpop.eup %612 }
 0x25f   :  { %v512_v52 = vmul.f32 0.5, %v613_v51  ;;  %v615_v54 = vpop.eup %614 }
 0x261   :  { %v513_v53 = vadd.f32 0.5, %v512_v52 }
 0x263   :  { %v514_v55 = vmul.f32 %v615_v54, %v513_v53 }
 0x265   :  { %515 = vst [vmem:[#allocation14] sm:$0xff] %v514_v55 }
 0x266   :  { %781 = shalt.err (!%p778_p4)
}
 0x267   :  { %s782_s28 = scalar_lea.hbm %s1004_s9, 128 }
 0x268   :  { %p783_p5 = scmp.ne.s32.totalorder %s1004_s9, %s782_s28  ;;  %p786_p6 = scmp.lt.u32.totalorder %s782_s28, %s1004_s9 }
 0x26a   :  { %p788_p7 = pnand %p786_p6, %p783_p5 }
 0x26c   :  { %791 = shalt.err (!%p788_p7)
}
 0x26d   :  { %525 = dma.vmem_to_hbm [thread:$0]  %s523_s17, 128, %s1004_s9, [#allocation4]  }
 0x26e   :  { %800 = dma.done.wait [#allocation4], 128  }
 0x26f   :  { %801 = vsyncadd [#allocation4], 4294967168 }
 0x270   :  { %529 = vsyncpa [#allocation3], 1 }
 0x271   :  { %530 = vsyncpa [#allocation6], 1 }
 0x272   :  { %531 = vsyncpa [#allocation9], 1 }
 0x273   :  { %532 = vsyncpa [#allocation12], 1 }
 0x274   :  { %533 = vsyncpa [#allocation4], 1 }

</bundles_post_ra>
